<compile_context>
chip_gen: v7x
topology: tpu7x:2x2x1
jax: 0.10.0
libtpu: 0.0.40
codegen_flags: <defaults>
</compile_context>

<pallas_src>
import functools

import jax
import jax.numpy as jnp
from jax.experimental import pallas as pl
from jax.experimental.pallas import tpu as pltpu


def _round_up(n, m):
    return ((n + m - 1) // m) * m


# -----------------------------------------------------------------------------
# Pallas kernel: fused  embedder MLP -> (policy ++ value) head -> log_softmax
# -----------------------------------------------------------------------------
def _policy_kernel(x_ref, we_ref, be_ref, wh_ref, bh_ref, out_ref, *, act):
    # hidden = relu(x @ W_emb + b_emb)   (bf16 operands, f32 accumulate)
    hidden = jnp.dot(x_ref[...], we_ref[...], preferred_element_type=jnp.float32)
    hidden = jnp.maximum(hidden + be_ref[...], 0.0)          # f32 vector math

    # fused head: cols [0, act) = policy logits, col `act` = value, rest pad.
    head = jnp.dot(hidden.astype(wh_ref.dtype), wh_ref[...],
                   preferred_element_type=jnp.float32)
    head = head + bh_ref[...]

    # log_softmax over the first `act` lanes only (mask out value/pad lanes).
    col = jax.lax.broadcasted_iota(jnp.int32, head.shape, 1)
    valid = col < act
    logits = jnp.where(valid, head, jnp.float32(-1e30))
    m = jnp.max(logits, axis=1, keepdims=True)
    shifted = logits - m
    lse = jnp.log(jnp.sum(jnp.exp(shifted), axis=1, keepdims=True))
    logp = shifted - lse

    # Lane-dense (tile_b, 128) output: log-probs in [:act], raw value in col
    # `act`, zeros in the padding lanes.  Sliced apart in the wrapper.
    out_ref[...] = jnp.where(valid, logp, head)


# -----------------------------------------------------------------------------
# Wrapper mirroring CategoricalPolicy.forward (recurrent=False)
# -----------------------------------------------------------------------------
def categorical_policy_forward(x_nchw, params, hx, masks):
    """Returns (log_probs, v, hx): log_probs are the Categorical logits
    (log_softmax output), v has shape [B]."""
    del masks  # only used by the (unimplemented) recurrent path
    B = x_nchw.shape[0]
    x_flat = x_nchw.reshape(B, -1)                       # glue: flatten NCHW

    we = params["w_emb"].astype(jnp.bfloat16)
    be = params["b_emb"].astype(jnp.float32)
    d_in, hid = we.shape
    act = params["w_pi"].shape[1]
    d_head = _round_up(act + 1, 128)                     # lane-dense head width

    # Fuse policy + value weights/biases into one 128-padded head.
    w_head = jnp.zeros((hid, d_head), jnp.float32)
    w_head = w_head.at[:, :act].set(params["w_pi"])
    w_head = w_head.at[:, act:act + 1].set(params["w_v"])
    w_head = w_head.astype(jnp.bfloat16)
    b_head = jnp.zeros((1, d_head), jnp.float32)
    b_head = b_head.at[:, :act].set(params["b_pi"])
    b_head = b_head.at[:, act:act + 1].set(params["b_v"])

    # Pad batch to a sublane/packing-friendly tile and grid over it.
    tile_b = min(128, _round_up(B, 16))
    B_pad = _round_up(B, tile_b)
    x_b = jnp.pad(x_flat.astype(jnp.bfloat16), ((0, B_pad - B), (0, 0)))

    kernel = functools.partial(_policy_kernel, act=act)
    bytes_accessed = int(x_b.size * 2 + we.size * 2 + be.size * 4
                         + w_head.size * 2 + b_head.size * 4
                         + B_pad * d_head * 4)

    out = pl.pallas_call(
        kernel,
        grid=(B_pad // tile_b,),
        in_specs=[
            pl.BlockSpec((tile_b, d_in), lambda i: (i, 0)),   # activations tile
            pl.BlockSpec((d_in, hid), lambda i: (0, 0)),      # weights resident
            pl.BlockSpec((1, hid), lambda i: (0, 0)),
            pl.BlockSpec((hid, d_head), lambda i: (0, 0)),
            pl.BlockSpec((1, d_head), lambda i: (0, 0)),
        ],
        out_specs=pl.BlockSpec((tile_b, d_head), lambda i: (i, 0)),
        out_shape=jax.ShapeDtypeStruct((B_pad, d_head), jnp.float32),
        compiler_params=pltpu.CompilerParams(
            dimension_semantics=("parallel",),
            vmem_limit_bytes=32 * 1024 * 1024),
        cost_estimate=pl.CostEstimate(
            flops=int(2 * B_pad * (d_in * hid + hid * d_head)),
            transcendentals=int(B_pad * d_head),
            bytes_accessed=bytes_accessed),
    )(x_b, we, be, w_head, b_head)

    log_probs = out[:B, :act]          # glue: strip lane/batch padding
    v = out[:B, act]                   # glue: value column, shape [B]
    # Categorical(logits=log_probs): log_softmax is idempotent, so log_probs
    # are exactly the distribution's logits / log-probabilities.
    return log_probs, v, hx


# -----------------------------------------------------------------------------
# Deterministic parameter init (orthogonal, like orthogonal_init in the repo)
# -----------------------------------------------------------------------------
def _orthogonal(key, in_dim, out_dim, gain):
    init = jax.nn.initializers.orthogonal(scale=gain)
    return init(key, (in_dim, out_dim), jnp.float32)


def make_params(key, d_in, hidden, action_size):
    k_emb, k_pi, k_v = jax.random.split(key, 3)
    return {
        # embedder: Linear(d_in -> hidden), relu  (gain sqrt(2) is typical)
        "w_emb": _orthogonal(k_emb, d_in, hidden, jnp.sqrt(2.0)),
        "b_emb": jnp.zeros((1, hidden), jnp.float32),
        # fc_policy: orthogonal_init(..., gain=0.01)
        "w_pi": _orthogonal(k_pi, hidden, action_size, 0.01),
        "b_pi": jnp.zeros((1, action_size), jnp.float32),
        # fc_value: orthogonal_init(..., gain=1.0)
        "w_v": _orthogonal(k_v, hidden, 1, 1.0),
        "b_v": jnp.zeros((1, 1), jnp.float32),
    }


# -----------------------------------------------------------------------------
# Demo
# -----------------------------------------------------------------------------
if __name__ == "__main__":
    B, C, H, W = 2, 4, 16, 16
    HIDDEN = 32
    ACTION_SIZE = 15

    key = jax.random.PRNGKey(0)
    k_x, k_p = jax.random.split(key)

    x = jax.random.normal(k_x, (B, C, H, W), jnp.float32)   # NCHW observation
    hx = jnp.zeros((B, HIDDEN), jnp.float32)                # unused (not recurrent)
    masks = jnp.ones((B,), jnp.float32)                     # unused (not recurrent)
    params = make_params(k_p, C * H * W, HIDDEN, ACTION_SIZE)

    fwd = jax.jit(functools.partial(categorical_policy_forward, params=params))
    log_probs, v, hx_out = fwd(x, hx=hx, masks=masks)
    jax.block_until_ready((log_probs, v, hx_out))

    # Sanity check against a plain-JAX reference using the same bf16-rounded
    # matmul operands (f32 accumulation), so only accumulation order differs.
    x_flat = x.reshape(B, -1)
    xb = x_flat.astype(jnp.bfloat16).astype(jnp.float32)
    web = params["w_emb"].astype(jnp.bfloat16).astype(jnp.float32)
    hid_ref = jnp.maximum(xb @ web + params["b_emb"], 0.0)
    hid_b = hid_ref.astype(jnp.bfloat16).astype(jnp.float32)
    wpb = params["w_pi"].astype(jnp.bfloat16).astype(jnp.float32)
    wvb = params["w_v"].astype(jnp.bfloat16).astype(jnp.float32)
    logits_ref = hid_b @ wpb + params["b_pi"]
    logp_ref = jax.nn.log_softmax(logits_ref, axis=1)
    v_ref = (hid_b @ wvb + params["b_v"]).reshape(-1)

    assert log_probs.shape == (B, ACTION_SIZE)
    assert v.shape == (B,)
    assert jnp.allclose(log_probs, logp_ref, atol=3e-3)
    assert jnp.allclose(v, v_ref, atol=5e-2)
    assert jnp.allclose(jnp.sum(jnp.exp(log_probs), axis=1), 1.0, atol=1e-4)

    print("KERNEL_OK")
</pallas_src>

<mosaic_0001>
module attributes {stable_mosaic.version = 11 : i64} {
  func.func @_policy_kernel(%arg0: i32, %arg1: memref<16x1024xbf16, #tpu.memory_space<vmem>>, %arg2: memref<1024x32xbf16, #tpu.memory_space<vmem>>, %arg3: memref<1x32xf32, #tpu.memory_space<vmem>>, %arg4: memref<32x128xbf16, #tpu.memory_space<vmem>>, %arg5: memref<1x128xf32, #tpu.memory_space<vmem>>, %arg6: memref<16x128xf32, #tpu.memory_space<vmem>>) attributes {dimension_semantics = [#tpu.dimension_semantics<parallel>], iteration_bounds = array<i64: 1>, scalar_prefetch = 0 : i64, scratch_operands = 0 : i64, tpu.core_type = #tpu.core_type<tc>, window_params = [{transform_indices = @transform_0, window_bounds = array<i64: 16, 1024>}, {pipeline_mode = #tpu.pipeline_mode<synchronous>, transform_indices = @transform_1, window_bounds = array<i64: 1024, 32>}, {pipeline_mode = #tpu.pipeline_mode<synchronous>, transform_indices = @transform_2, window_bounds = array<i64: 1, 32>}, {pipeline_mode = #tpu.pipeline_mode<synchronous>, transform_indices = @transform_3, window_bounds = array<i64: 32, 128>}, {pipeline_mode = #tpu.pipeline_mode<synchronous>, transform_indices = @transform_4, window_bounds = array<i64: 1, 128>}, {transform_indices = @transform_5, window_bounds = array<i64: 16, 128>}]} {
    %c0 = arith.constant 0 : index
    %c0_0 = arith.constant 0 : index
    %0 = vector.load %arg1[%c0, %c0_0] : memref<16x1024xbf16, #tpu.memory_space<vmem>>, vector<16x1024xbf16>
    %c0_1 = arith.constant 0 : index
    %c0_2 = arith.constant 0 : index
    %1 = vector.load %arg2[%c0_1, %c0_2] : memref<1024x32xbf16, #tpu.memory_space<vmem>>, vector<1024x32xbf16>
    %cst = arith.constant dense<0.000000e+00> : vector<16x32xf32>
    %2 = tpu.matmul %0, %1, %cst {dimension_numbers = #tpu.dot_dimension_numbers<[1], [0], [0], [1], [0, 0, 1, 1], [], []>} : vector<16x1024xbf16>, vector<1024x32xbf16>, vector<16x32xf32> -> vector<16x32xf32>
    %c0_3 = arith.constant 0 : index
    %c0_4 = arith.constant 0 : index
    %3 = vector.load %arg3[%c0_3, %c0_4] : memref<1x32xf32, #tpu.memory_space<vmem>>, vector<1x32xf32>
    %4 = vector.broadcast %3 : vector<1x32xf32> to vector<16x32xf32>
    %5 = arith.addf %2, %4 : vector<16x32xf32>
    %cst_5 = arith.constant 0.000000e+00 : f32
    %6 = vector.broadcast %cst_5 : f32 to vector<16x32xf32>
    %7 = arith.maximumf %5, %6 : vector<16x32xf32>
    %8 = arith.truncf %7 : vector<16x32xf32> to vector<16x32xbf16>
    %c0_6 = arith.constant 0 : index
    %c0_7 = arith.constant 0 : index
    %9 = vector.load %arg4[%c0_6, %c0_7] : memref<32x128xbf16, #tpu.memory_space<vmem>>, vector<32x128xbf16>
    %cst_8 = arith.constant dense<0.000000e+00> : vector<16x128xf32>
    %10 = tpu.matmul %8, %9, %cst_8 {dimension_numbers = #tpu.dot_dimension_numbers<[1], [0], [0], [1], [0, 0, 1, 1], [], []>} : vector<16x32xbf16>, vector<32x128xbf16>, vector<16x128xf32> -> vector<16x128xf32>
    %c0_9 = arith.constant 0 : index
    %c0_10 = arith.constant 0 : index
    %11 = vector.load %arg5[%c0_9, %c0_10] : memref<1x128xf32, #tpu.memory_space<vmem>>, vector<1x128xf32>
    %12 = vector.broadcast %11 : vector<1x128xf32> to vector<16x128xf32>
    %13 = arith.addf %10, %12 : vector<16x128xf32>
    %14 = tpu.iota {dimensions = array<i32: 1>} : vector<16x128xi32>
    %c15_i32 = arith.constant 15 : i32
    %15 = vector.broadcast %c15_i32 : i32 to vector<16x128xi32>
    %16 = arith.cmpi slt, %14, %15 : vector<16x128xi32>
    %cst_11 = arith.constant -1.000000e+30 : f32
    %17 = vector.broadcast %cst_11 : f32 to vector<16x128xf32>
    %18 = arith.select %16, %13, %17 : vector<16x128xi1>, vector<16x128xf32>
    %cst_12 = arith.constant dense<0xFF800000> : vector<16xf32>
    %19 = vector.multi_reduction <maximumf>, %18, %cst_12 [1] : vector<16x128xf32> to vector<16xf32>
    %20 = vector.shape_cast %19 : vector<16xf32> to vector<16x1xf32>
    %21 = vector.broadcast %20 : vector<16x1xf32> to vector<16x128xf32>
    %22 = arith.subf %18, %21 : vector<16x128xf32>
    %23 = math.exp %22 : vector<16x128xf32>
    %cst_13 = arith.constant dense<0.000000e+00> : vector<16xf32>
    %24 = vector.multi_reduction <add>, %23, %cst_13 [1] : vector<16x128xf32> to vector<16xf32>
    %25 = vector.shape_cast %24 : vector<16xf32> to vector<16x1xf32>
    %26 = math.log %25 : vector<16x1xf32>
    %27 = vector.broadcast %26 : vector<16x1xf32> to vector<16x128xf32>
    %28 = arith.subf %22, %27 : vector<16x128xf32>
    %29 = arith.select %16, %28, %13 : vector<16x128xi1>, vector<16x128xf32>
    %c0_14 = arith.constant 0 : index
    %c0_15 = arith.constant 0 : index
    %30 = vector.load %arg6[%c0_14, %c0_15] : memref<16x128xf32, #tpu.memory_space<vmem>>, vector<16x128xf32>
    tpu.vector_store %arg6[%c0_14, %c0_15], %29 {strides = array<i32>} : memref<16x128xf32, #tpu.memory_space<vmem>>, vector<16x128xf32>,
    return
  }
  func.func @transform_0(%arg0: i32) -> (i32, i32) {
    %c0_i32 = arith.constant 0 : i32
    %c0_i32_0 = arith.constant 0 : i32
    return %arg0, %c0_i32 : i32, i32
  }
  func.func @transform_1(%arg0: i32) -> (i32, i32) {
    %c0_i32 = arith.constant 0 : i32
    %c0_i32_0 = arith.constant 0 : i32
    %c0_i32_1 = arith.constant 0 : i32
    return %c0_i32, %c0_i32_0 : i32, i32
  }
  func.func @transform_2(%arg0: i32) -> (i32, i32) {
    %c0_i32 = arith.constant 0 : i32
    %c0_i32_0 = arith.constant 0 : i32
    %c0_i32_1 = arith.constant 0 : i32
    return %c0_i32, %c0_i32_0 : i32, i32
  }
  func.func @transform_3(%arg0: i32) -> (i32, i32) {
    %c0_i32 = arith.constant 0 : i32
    %c0_i32_0 = arith.constant 0 : i32
    %c0_i32_1 = arith.constant 0 : i32
    return %c0_i32, %c0_i32_0 : i32, i32
  }
  func.func @transform_4(%arg0: i32) -> (i32, i32) {
    %c0_i32 = arith.constant 0 : i32
    %c0_i32_0 = arith.constant 0 : i32
    %c0_i32_1 = arith.constant 0 : i32
    return %c0_i32, %c0_i32_0 : i32, i32
  }
  func.func @transform_5(%arg0: i32) -> (i32, i32) {
    %c0_i32 = arith.constant 0 : i32
    %c0_i32_0 = arith.constant 0 : i32
    return %arg0, %c0_i32 : i32, i32
  }
}

</mosaic_0001>

<bundles_post_ra>
// kernel: categorical_policy_forward.1
= control target key start
LH: loop header
LB: loop body
LE: loop exit
PB: predicated region body
PF: predicated region fallthrough
CT: control target
= control target key end

     0   :  { %vm1109_vm0 = vmmov 0   ;;  %vm778_vm1 = vcmask 261120   ;;  %s1378_s1 = inlined_call_operand.vmem [shape: bf16[1024,32], index: 1, kind: input, shape index: {}]   ;;  %s1379_s0 = inlined_call_operand.vmem [shape: bf16[16,1024], index: 0, kind: input, shape index: {}]   ;;  %s1380_s3 = inlined_call_operand.vmem [shape: bf16[32,128], index: 3, kind: input, shape index: {}]   ;;  %s1381_s2 = inlined_call_operand.vmem [shape: f32[1,32], index: 2, kind: input, shape index: {}]   ;;  %s1382_s4 = inlined_call_operand.vmem [shape: f32[1,128], index: 4, kind: input, shape index: {}]   ;;  %s1383_s5 = inlined_call_operand.vmem [shape: f32[16,128], index: 5, kind: output, shape index: {}]  }
   0x1   :  { %v1034_v0 = vld [vmem:[%s1378_s1 + $0x40] sm:$0xff]   ;;  %v1038_v4 = vld [vmem:[%s1378_s1 + $0x48] sm:$0xff]   ;;  %v1042_v8 = vld [vmem:[%s1378_s1 + $0x50] sm:$0xff]  }
   0x2   :  { %v1035_v1 = vld [vmem:[%s1378_s1 + $0xc0] sm:$0xff]   ;;  %933 = vmatprep.subr.bf16.mxu0 %v1034_v0  ;;  %v1039_v5 = vld [vmem:[%s1378_s1 + $0xc8] sm:$0xff]   ;;  %v1043_v9 = vld [vmem:[%s1378_s1 + $0xd0] sm:$0xff]  }
   0x3   :  { %v1036_v2 = vld [vmem:[%s1378_s1] sm:$0xff]   ;;  %955 = vmatprep.subr.bf16.mxu1 %v1035_v1  ;;  %v1040_v6 = vld [vmem:[%s1378_s1 + $0x8] sm:$0xff]   ;;  %v1044_v10 = vld [vmem:[%s1378_s1 + $0x10] sm:$0xff]  }
   0x4   :  { %v1037_v3 = vld [vmem:[%s1378_s1 + $0x80] sm:$0xff]   ;;  %934 = vmatpush3.bf16.msra.mxu0 %v1036_v2  ;;  %v1041_v7 = vld [vmem:[%s1378_s1 + $0x88] sm:$0xff]   ;;  %v1045_v11 = vld [vmem:[%s1378_s1 + $0x90] sm:$0xff]  }
   0x5   :  { %956 = vmatpush3.bf16.msra.mxu1 %v1037_v3  ;;  %935 = vmatprep.subr.bf16.mxu0 %v1038_v4  ;;  %v1046_v12 = vld [vmem:[%s1378_s1 + $0x58] sm:$0xff]   ;;  %v1050_v16 = vld [vmem:[%s1378_s1 + $0x60] sm:$0xff]   ;;  %v1054_v20 = vld [vmem:[%s1378_s1 + $0x68] sm:$0xff]  }
   0x6   :  { %957 = vmatprep.subr.bf16.mxu1 %v1039_v5  ;;  %v1047_v13 = vld [vmem:[%s1378_s1 + $0xd8] sm:$0xff]   ;;  %v1051_v17 = vld [vmem:[%s1378_s1 + $0xe0] sm:$0xff]   ;;  %v1055_v21 = vld [vmem:[%s1378_s1 + $0xe8] sm:$0xff]  }
   0x7   :  { %v1048_v14 = vld [vmem:[%s1378_s1 + $0x18] sm:$0xff]   ;;  %v1052_v18 = vld [vmem:[%s1378_s1 + $0x20] sm:$0xff]   ;;  %v1056_v22 = vld [vmem:[%s1378_s1 + $0x28] sm:$0xff]  }
   0x8   :  { %936 = vmatpush3.bf16.msra.mxu0 %v1040_v6  ;;  %v1049_v15 = vld [vmem:[%s1378_s1 + $0x98] sm:$0xff]   ;;  %v1053_v19 = vld [vmem:[%s1378_s1 + $0xa0] sm:$0xff]   ;;  %v1057_v23 = vld [vmem:[%s1378_s1 + $0xa8] sm:$0xff]  }
   0x9   :  { %958 = vmatpush3.bf16.msra.mxu1 %v1041_v7  ;;  %937 = vmatprep.subr.bf16.mxu0 %v1042_v8  ;;  %v1058_v24 = vld [vmem:[%s1378_s1 + $0x70] sm:$0xff]   ;;  %v1062_v28 = vld [vmem:[%s1378_s1 + $0x78] sm:$0xff]   ;;  %v21_v32 = vld [vmem:[%s1379_s0] sm:$0xff] }
   0xa   :  { %959 = vmatprep.subr.bf16.mxu1 %v1043_v9  ;;  %v1059_v25 = vld [vmem:[%s1378_s1 + $0xf0] sm:$0xff]   ;;  %v1063_v29 = vld [vmem:[%s1378_s1 + $0xf8] sm:$0xff]   ;;  %v25_v33 = vld [vmem:[%s1379_s0 + $0x20] sm:$0xff] }
   0xb   :  { %v1060_v26 = vld [vmem:[%s1378_s1 + $0x30] sm:$0xff]   ;;  %v1064_v30 = vld [vmem:[%s1378_s1 + $0x38] sm:$0xff]   ;;  %v22_v34 = vld [vmem:[%s1379_s0 + $0x8] sm:$0xff]  ;;  %v857_v35 = vcombine.low %v21_v32, %v25_v33  ;;  %v858_v36 = vcombine.high %v21_v32, %v25_v33 }
   0xc   :  { %938 = vmatpush3.bf16.msra.mxu0 %v1044_v10  ;;  %v1061_v27 = vld [vmem:[%s1378_s1 + $0xb0] sm:$0xff]   ;;  %v1065_v31 = vld [vmem:[%s1378_s1 + $0xb8] sm:$0xff]   ;;  %v26_v37 = vld [vmem:[%s1379_s0 + $0x28] sm:$0xff] }
   0xd   :  { %960 = vmatpush3.bf16.msra.mxu1 %v1045_v11  ;;  %939 = vmatprep.subr.bf16.mxu0 %v1046_v12  ;;  %v859_v38 = vcombine.low %v22_v34, %v26_v37  ;;  %v860_v39 = vcombine.high %v22_v34, %v26_v37  ;;  %v1066_v40 = vld [vmem:[%s1378_s1 + $0x140] sm:$0xff]   ;;  %v1070_v44 = vld [vmem:[%s1378_s1 + $0x148] sm:$0xff]   ;;  %v1074_v48 = vld [vmem:[%s1378_s1 + $0x150] sm:$0xff]  }
   0xe   :  { %961 = vmatprep.subr.bf16.mxu1 %v1047_v13  ;;  %620 = vmatprep.mubr.bf16.mxu0 %v858_v36  ;;  %v1067_v41 = vld [vmem:[%s1378_s1 + $0x1c0] sm:$0xff]   ;;  %v1071_v45 = vld [vmem:[%s1378_s1 + $0x1c8] sm:$0xff]   ;;  %v1075_v49 = vld [vmem:[%s1378_s1 + $0x1d0] sm:$0xff]  }
   0xf   :  { %661 = vmatprep.mubr.bf16.mxu1 %v860_v39  ;;  %v1068_v42 = vld [vmem:[%s1378_s1 + $0x100] sm:$0xff]   ;;  %v1072_v46 = vld [vmem:[%s1378_s1 + $0x108] sm:$0xff]   ;;  %v1076_v50 = vld [vmem:[%s1378_s1 + $0x110] sm:$0xff]  }
  0x10   :  { %940 = vmatpush3.bf16.msra.mxu0 %v1048_v14  ;;  %v1069_v43 = vld [vmem:[%s1378_s1 + $0x180] sm:$0xff]   ;;  %v1073_v47 = vld [vmem:[%s1378_s1 + $0x188] sm:$0xff]   ;;  %v1077_v51 = vld [vmem:[%s1378_s1 + $0x190] sm:$0xff]  }
  0x11   :  { %962 = vmatpush3.bf16.msra.mxu1 %v1049_v15  ;;  %941 = vmatprep.subr.bf16.mxu0 %v1050_v16  ;;  %v1078_v52 = vld [vmem:[%s1378_s1 + $0x158] sm:$0xff]   ;;  %v1082_v56 = vld [vmem:[%s1378_s1 + $0x160] sm:$0xff]   ;;  %v1086_v60 = vld [vmem:[%s1378_s1 + $0x168] sm:$0xff]  }
  0x12   :  { %963 = vmatprep.subr.bf16.mxu1 %v1051_v17  ;;  %v1079_v53 = vld [vmem:[%s1378_s1 + $0x1d8] sm:$0xff]   ;;  %v1083_v57 = vld [vmem:[%s1378_s1 + $0x1e0] sm:$0xff]   ;;  %v1087_v61 = vld [vmem:[%s1378_s1 + $0x1e8] sm:$0xff]   ;;  %v1108_v17 = vmov 0.0  }
  0x13   :  { %v1080_v54 = vld [vmem:[%s1378_s1 + $0x118] sm:$0xff]   ;;  %v1084_v58 = vld [vmem:[%s1378_s1 + $0x120] sm:$0xff]   ;;  %v1088_v62 = vld [vmem:[%s1378_s1 + $0x128] sm:$0xff]  }
  0x14   :  { %942 = vmatpush3.bf16.msra.mxu0 %v1052_v18  ;;  %v1081_v55 = vld [vmem:[%s1378_s1 + $0x198] sm:$0xff]   ;;  %v1085_v59 = vld [vmem:[%s1378_s1 + $0x1a0] sm:$0xff]   ;;  %v1089_v63 = vld [vmem:[%s1378_s1 + $0x1a8] sm:$0xff]  }
  0x15   :  { %964 = vmatpush3.bf16.msra.mxu1 %v1053_v19  ;;  %943 = vmatprep.subr.bf16.mxu0 %v1054_v20  ;;  %v1090_v0 = vld [vmem:[%s1378_s1 + $0x170] sm:$0xff]   ;;  %v1094_v4 = vld [vmem:[%s1378_s1 + $0x178] sm:$0xff]   ;;  %v1098_v16 = vld [vmem:[%s1380_s3] sm:$0xff]  }
  0x16   :  { %965 = vmatprep.subr.bf16.mxu1 %v1055_v21  ;;  %v1091_v1 = vld [vmem:[%s1378_s1 + $0x1f0] sm:$0xff]   ;;  %v1095_v5 = vld [vmem:[%s1378_s1 + $0x1f8] sm:$0xff]   ;;  %v1099_v18 = vld [vmem:[%s1380_s3 + $0x8] sm:$0xff]  }
  0x17   :  { %v1092_v2 = vld [vmem:[%s1378_s1 + $0x130] sm:$0xff]   ;;  %v1096_v6 = vld [vmem:[%s1378_s1 + $0x138] sm:$0xff]   ;;  %v856_v21 = vld [vmem:[%s1381_s2] ss:$0 sm:$0xff] }
  0x18   :  { %944 = vmatpush3.bf16.msra.mxu0 %v1056_v22  ;;  %v1093_v3 = vld [vmem:[%s1378_s1 + $0x1b0] sm:$0xff]   ;;  %v1097_v7 = vld [vmem:[%s1378_s1 + $0x1b8] sm:$0xff]  }
  0x19   :  { %966 = vmatpush3.bf16.msra.mxu1 %v1057_v23  ;;  %945 = vmatprep.subr.bf16.mxu0 %v1058_v24  ;;  %v23_v8 = vld [vmem:[%s1379_s0 + $0x10] sm:$0xff]  ;;  %v24_v12 = vld [vmem:[%s1379_s0 + $0x18] sm:$0xff] }
  0x1a   :  { %967 = vmatprep.subr.bf16.mxu1 %v1059_v25  ;;  %v27_v9 = vld [vmem:[%s1379_s0 + $0x30] sm:$0xff]  ;;  %v28_v13 = vld [vmem:[%s1379_s0 + $0x38] sm:$0xff] }
  0x1b   :  { %v861_v10 = vcombine.low %v23_v8, %v27_v9  ;;  %v862_v11 = vcombine.high %v23_v8, %v27_v9  ;;  %v863_v14 = vcombine.low %v24_v12, %v28_v13  ;;  %v864_v15 = vcombine.high %v24_v12, %v28_v13 }
  0x1c   :  { %946 = vmatpush3.bf16.msra.mxu0 %v1060_v26 }
  0x1d   :  { %968 = vmatpush3.bf16.msra.mxu1 %v1061_v27  ;;  %947 = vmatprep.subr.bf16.mxu0 %v1062_v28 }
  0x1e   :  { %969 = vmatprep.subr.bf16.mxu1 %v1063_v29 }
  0x20   :  { %948 = vmatpush3.bf16.msra.mxu0 %v1064_v30 }
  0x21   :  { %970 = vmatpush3.bf16.msra.mxu1 %v1065_v31  ;;  %977 = vmatprep.subr.bf16.mxu0 %v1066_v40 }
  0x22   :  { %999 = vmatprep.subr.bf16.mxu1 %v1067_v41 }
  0x23   :  { %621 = vmatmul.mubr.bf16.vlgmr.msra.gmra.mrb[0].mxu0 %v857_v35 }
  0x24   :  { %662 = vmatmul.mubr.bf16.vlgmr.msra.gmra.mrb[0].mxu1 %v859_v38  ;;  %978 = vmatpush3.bf16.msra.mxu0 %v1068_v42 }
  0x25   :  { %1000 = vmatpush3.bf16.msra.mxu1 %v1069_v43  ;;  %979 = vmatprep.subr.bf16.mxu0 %v1070_v44 }
  0x26   :  { %1001 = vmatprep.subr.bf16.mxu1 %v1071_v45  ;;  %702 = vmatprep.mubr.bf16.mxu0 %v862_v11 }
  0x27   :  { %743 = vmatprep.mubr.bf16.mxu1 %v864_v15 }
  0x28   :  { %980 = vmatpush3.bf16.msra.mxu0 %v1072_v46 }
  0x29   :  { %1002 = vmatpush3.bf16.msra.mxu1 %v1073_v47  ;;  %981 = vmatprep.subr.bf16.mxu0 %v1074_v48 }
  0x2a   :  { %1003 = vmatprep.subr.bf16.mxu1 %v1075_v49 }
  0x2c   :  { %982 = vmatpush3.bf16.msra.mxu0 %v1076_v50 }
  0x2d   :  { %1004 = vmatpush3.bf16.msra.mxu1 %v1077_v51  ;;  %983 = vmatprep.subr.bf16.mxu0 %v1078_v52 }
  0x2e   :  { %1005 = vmatprep.subr.bf16.mxu1 %v1079_v53 }
  0x30   :  { %984 = vmatpush3.bf16.msra.mxu0 %v1080_v54 }
  0x31   :  { %1006 = vmatpush3.bf16.msra.mxu1 %v1081_v55  ;;  %985 = vmatprep.subr.bf16.mxu0 %v1082_v56  ;;  %v823_v55 = vlaneseq }
  0x32   :  { %1007 = vmatprep.subr.bf16.mxu1 %v1083_v57  ;;  %v929_v57 = vld [vmem:[%s1382_s4] ss:$0 sm:$0xff] }
  0x33   :  { %v824_v56 = vand.u32 127, %v823_v55 }
  0x34   :  { %986 = vmatpush3.bf16.msra.mxu0 %v1084_v58 }
  0x35   :  { %1008 = vmatpush3.bf16.msra.mxu1 %v1085_v59  ;;  %987 = vmatprep.subr.bf16.mxu0 %v1086_v60  ;;  %vm825_vm2 = vcmp.lt.s32.totalorder %v824_v56, 15 }
  0x36   :  { %1009 = vmatprep.subr.bf16.mxu1 %v1087_v61 }
  0x38   :  { %988 = vmatpush3.bf16.msra.mxu0 %v1088_v62 }
  0x39   :  { %1010 = vmatpush3.bf16.msra.mxu1 %v1089_v63  ;;  %989 = vmatprep.subr.bf16.mxu0 %v1090_v0 }
  0x3a   :  { %1011 = vmatprep.subr.bf16.mxu1 %v1091_v1 }
  0x3c   :  { %990 = vmatpush3.bf16.msra.mxu0 %v1092_v2 }
  0x3d   :  { %1012 = vmatpush3.bf16.msra.mxu1 %v1093_v3  ;;  %991 = vmatprep.subr.bf16.mxu0 %v1094_v4 }
  0x3e   :  { %1013 = vmatprep.subr.bf16.mxu1 %v1095_v5 }
  0x40   :  { %992 = vmatpush3.bf16.msra.mxu0 %v1096_v6 }
  0x41   :  { %1014 = vmatpush3.bf16.msra.mxu1 %v1097_v7  ;;  %1024 = vmatprep.subr.bf16.mxu0 %v1108_v17 }
  0x43   :  { %703 = vmatmul.mubr.bf16.vlgmr.msra.gmra.mrb[4].mxu0 %v861_v10 }
  0x44   :  { %744 = vmatmul.mubr.bf16.vlgmr.msra.gmra.mrb[4].mxu1 %v863_v14  ;;  %1025 = vmatpush3.bf16.msra.mxu0 %v1098_v16 }
  0x45   :  { %1026 = vmatprep.subr.bf16.mxu0 %v1108_v17  ;;  %1028 = vmatprep.mubr.msk.bf16.mxu0 %vm1109_vm0, %v1108_v17 }
  0x48   :  { %1027 = vmatpush3.bf16.msra.mxu0 %v1099_v18 }
  0xf6   :  { %v949_v19 = vpop.f32.mrb[0].mxu0 }
  0xf7   :  { %v971_v20 = vpop.f32.mrb[0].mxu1  ;;  %v950_v22 = vpop.f32.mrb[1].mxu0 }
  0xf8   :  { %v951_v23 = vadd.f32 %v950_v22, %v949_v19  ;;  %v972_v24 = vpop.f32.mrb[1].mxu1  ;;  %v952_v25 = vpop.f32.mrb[2].mxu0 }
  0xf9   :  { %v973_v26 = vadd.f32 %v972_v24, %v971_v20  ;;  %v974_v27 = vpop.f32.mrb[2].mxu1  ;;  %v953_v28 = vpop.f32.mrb[3].mxu0 }
  0xfa   :  { %v623_v29 = vadd.f32 %v951_v23, %v856_v21  ;;  %v954_v30 = vadd.f32 %v953_v28, %v952_v25  ;;  %v975_v31 = vpop.f32.mrb[3].mxu1 }
  0xfb   :  { %v976_v32 = vadd.f32 %v975_v31, %v974_v27 }
  0xfc   :  { %v664_v33 = vadd.f32 %v973_v26, %v623_v29  ;;  %v626_v34 = vadd.f32 %v954_v30, %v856_v21 }
  0xfe   :  { %v667_v35 = vadd.f32 %v976_v32, %v626_v34 }
 0x116   :  { %v993_v36 = vpop.f32.mrb[4].mxu0 }
 0x117   :  { %v1015_v37 = vpop.f32.mrb[4].mxu1  ;;  %v994_v38 = vpop.f32.mrb[5].mxu0 }
 0x118   :  { %v995_v39 = vadd.f32 %v994_v38, %v993_v36  ;;  %v1016_v40 = vpop.f32.mrb[5].mxu1  ;;  %v996_v41 = vpop.f32.mrb[6].mxu0 }
 0x119   :  { %v1017_v42 = vadd.f32 %v1016_v40, %v1015_v37  ;;  %v1018_v43 = vpop.f32.mrb[6].mxu1  ;;  %v997_v44 = vpop.f32.mrb[7].mxu0 }
 0x11a   :  { %v705_v45 = vadd.f32 %v995_v39, %v664_v33  ;;  %v998_v46 = vadd.f32 %v997_v44, %v996_v41  ;;  %v1019_v47 = vpop.f32.mrb[7].mxu1 }
 0x11b   :  { %v1020_v48 = vadd.f32 %v1019_v47, %v1018_v43 }
 0x11c   :  { %v746_v49 = vadd.f32 %v1017_v42, %v705_v45  ;;  %v708_v50 = vadd.f32 %v998_v46, %v667_v35 }
 0x11e   :  { %v749_v51 = vadd.f32 %v1020_v48, %v708_v50  ;;  %v752_v52 = vmax.f32 %v746_v49, 0.0 }
 0x120   :  { %v753_v53 = vmax.f32 %v749_v51, 0.0 }
 0x122   :  { %v754_v54 = vpack.c.bf16 %v753_v53, %v752_v52 }
 0x124   :  { %1029 = vmatmul.mubr.msk.bf16.vlgmr.msra.gmra.mrb[8].mxu0 %vm778_vm1, %v754_v54 }
 0x1f7   :  { %v816_v58 = vpop.f32.mrb[8].mxu0 }
 0x1f8   :  { %v817_v59 = vadd.f32 %v929_v57, %v816_v58  ;;  %v1030_v60 = vpop.f32.mrb[9].mxu0 }
 0x1f9   :  { %v819_v61 = vpop.f32.mrb[10].mxu0 }
 0x1fa   :  { %v820_v62 = vadd.f32 %v929_v57, %v819_v61  ;;  %v1031_v63 = vpop.f32.mrb[11].mxu0  ;;  %v826_v0 = vsel %vm825_vm2, %v817_v59, -1e+30 }
 0x1fb   :  { %828 = vmax.xlane.f32.xlu0 %v826_v0 }
 0x1fc   :  { %v827_v1 = vsel %vm825_vm2, %v820_v62, -1e+30 }
 0x1ff   :  { %830 = vmax.xlane.f32.xlu0 %v827_v1 }
 0x288   :  { %v829_v2 = vpop.xlane.xlu0 %828 }
 0x289   :  { %v832_v3 = vsub.f32 %v826_v0, %v829_v2 }
 0x28b   :  { %v834_v4 = vmul.f32 1.442695, %v832_v3 }
 0x28c   :  { %v831_v5 = vpop.xlane.xlu0 %830 }
 0x28d   :  { %v833_v6 = vsub.f32 %v827_v1, %v831_v5  ;;  %1100 = vpow2.f32 %v834_v4 }
 0x28f   :  { %v836_v7 = vmul.f32 1.442695, %v833_v6 }
 0x291   :  { %1102 = vpow2.f32 %v836_v7 }
 0x297   :  { %v1101_v8 = vpop.eup %1100 }
 0x298   :  { %838 = vadd.xlane.f32.xlu1 %v1101_v8 }
 0x29b   :  { %v1103_v9 = vpop.eup %1102 }
 0x29c   :  { %840 = vadd.xlane.f32.xlu1 %v1103_v9 }
 0x325   :  { %v839_v10 = vpop.xlane.xlu1 %838 }
 0x326   :  { %1104 = vlog2.f32 %v839_v10 }
 0x329   :  { %v841_v11 = vpop.xlane.xlu1 %840 }
 0x32a   :  { %1106 = vlog2.f32 %v841_v11 }
 0x330   :  { %v1105_v12 = vpop.eup %1104 }
 0x331   :  { %v843_v13 = vmul.f32 0.6931472, %v1105_v12 }
 0x333   :  { %v846_v14 = vsub.f32 %v832_v3, %v843_v13 }
 0x334   :  { %v1107_v15 = vpop.eup %1106 }
 0x335   :  { %v848_v16 = vsel %vm825_vm2, %v846_v14, %v817_v59  ;;  %v845_v17 = vmul.f32 0.6931472, %v1107_v15 }
 0x336   :  { %850 = vst [vmem:[%s1383_s5] sm:$0xff] %v848_v16 }
 0x337   :  { %v847_v18 = vsub.f32 %v833_v6, %v845_v17 }
 0x339   :  { %v849_v19 = vsel %vm825_vm2, %v847_v18, %v820_v62 }
 0x33a   :  { %851 = vst [vmem:[%s1383_s5 + $0x8] sm:$0xff] %v849_v19 }

</bundles_post_ra>
